<compile_context>
chip_gen: v5e
topology: v5e:2x2
jax: 0.10.0
libtpu: 0.0.40
codegen_flags: <defaults>
</compile_context>

<pallas_src>
import functools

import jax
import jax.numpy as jnp
from jax.experimental import pallas as pl
from jax.experimental.pallas import tpu as pltpu


def _se_kernel(x_ref, w1t_ref, b1_ref, w2t_ref, b2_ref, o_ref, *, swish, inv_hw):
    # x_ref/o_ref: (Nb, C, HWp)  w1t: (C, C_se)  b1: (1, C_se)
    # w2t: (C_se, C)             b2: (1, C)
    # Global average pool over the (possibly zero-padded) spatial axis.
    # Zero padding contributes nothing to the sum; divide by the true HW.
    pooled = jnp.sum(x_ref[...].astype(jnp.float32), axis=-1) * inv_hw      # (Nb, C)

    # se_reduce: 1x1 conv == matmul + bias, then swish / relu
    h = jnp.dot(pooled, w1t_ref[...],
                preferred_element_type=jnp.float32) + b1_ref[...]           # (Nb, C_se)
    if swish:
        h = h * jax.nn.sigmoid(h)
    else:
        h = jnp.maximum(h, 0.0)

    # se_expand: 1x1 conv == matmul + bias, then sigmoid gate
    g = jnp.dot(h, w2t_ref[...],
                preferred_element_type=jnp.float32) + b2_ref[...]           # (Nb, C)
    gate = jax.nn.sigmoid(g).astype(o_ref.dtype)                            # (Nb, C)

    # Scale in the input dtype: no f32 copy of the whole activation tile.
    o_ref[...] = x_ref[...] * gate[:, :, None]


def _pick_batch_block(n, per_batch_bytes, budget_bytes=1 << 20):
    """Largest divisor of n whose block fits the budget; prefer >= 2 grid steps
    (v7x has 2 TensorCores that shard the parallel batch axis)."""
    divisors = [d for d in range(1, n + 1) if n % d == 0]
    fitting = [d for d in divisors if d * per_batch_bytes <= budget_bytes] or [1]
    if n >= 2:
        leaves_two_steps = [d for d in fitting if n // d >= 2]
        if leaves_two_steps:
            return max(leaves_two_steps)
    return max(fitting)


def squeeze_excitation(x, w1, b1, w2, b2, *, swish=True):
    """x: [N, C, H, W] (NCHW, as in PyTorch).
    w1: [C_se, C] (se_reduce 1x1 conv weight squeezed to 2D), b1: [C_se]
    w2: [C, C_se] (se_expand 1x1 conv weight squeezed to 2D), b2: [C]
    """
    N, C, H, W = x.shape
    HW = H * W
    C_se = w1.shape[0]

    # Lane-dense spatial axis: pad HW up to a multiple of 128 with zeros.
    HWp = ((HW + 127) // 128) * 128
    xr = x.reshape(N, C, HW)
    if HWp != HW:
        xr = jnp.pad(xr, ((0, 0), (0, 0), (0, HWp - HW)))

    w1t = jnp.transpose(w1)          # (C, C_se)
    w2t = jnp.transpose(w2)          # (C_se, C)
    b1r = b1.reshape(1, C_se)
    b2r = b2.reshape(1, C)

    per_batch_bytes = C * HWp * xr.dtype.itemsize
    nb = _pick_batch_block(N, per_batch_bytes)
    grid = (N // nb,)

    out = pl.pallas_call(
        functools.partial(_se_kernel, swish=swish, inv_hw=float(1.0 / HW)),
        out_shape=jax.ShapeDtypeStruct((N, C, HWp), x.dtype),
        grid=grid,
        in_specs=[
            pl.BlockSpec((nb, C, HWp), lambda n: (n, 0, 0)),
            pl.BlockSpec((C, C_se), lambda n: (0, 0)),
            pl.BlockSpec((1, C_se), lambda n: (0, 0)),
            pl.BlockSpec((C_se, C), lambda n: (0, 0)),
            pl.BlockSpec((1, C), lambda n: (0, 0)),
        ],
        out_specs=pl.BlockSpec((nb, C, HWp), lambda n: (n, 0, 0)),
        compiler_params=pltpu.CompilerParams(
            dimension_semantics=("parallel",)),
    )(xr, w1t, b1r, w2t, b2r)

    if HWp != HW:
        out = out[:, :, :HW]
    return out.reshape(N, C, H, W)


def _reference(x, w1, b1, w2, b2, *, swish=True):
    # Pure-JAX reference mirroring the PyTorch forward.
    pooled = jnp.mean(x, axis=(2, 3), keepdims=True)                     # (N,C,1,1)
    h = jnp.einsum("nchw,oc->nohw", pooled, w1) + b1[None, :, None, None]
    h = h * jax.nn.sigmoid(h) if swish else jnp.maximum(h, 0.0)
    g = jnp.einsum("nchw,oc->nohw", h, w2) + b2[None, :, None, None]
    return jax.nn.sigmoid(g) * x


def _make_params(key, C, C_se):
    k1, kb1, k2, kb2 = jax.random.split(key, 4)
    w1 = 0.1 * jax.random.normal(k1, (C_se, C), dtype=jnp.float32)
    b1 = 0.1 * jax.random.normal(kb1, (C_se,), dtype=jnp.float32)
    w2 = 0.1 * jax.random.normal(k2, (C, C_se), dtype=jnp.float32)
    b2 = 0.1 * jax.random.normal(kb2, (C,), dtype=jnp.float32)
    return w1, b1, w2, b2


if __name__ == "__main__":
    key = jax.random.PRNGKey(0)
    kx1, kp1, kx2, kp2 = jax.random.split(key, 4)

    # Case 1: HW already a 128-multiple (16x16=256), swish activation.
    N, C, H, W = 2, 8, 16, 16
    C_se = 4
    x = jax.random.normal(kx1, (N, C, H, W), dtype=jnp.float32)
    w1, b1, w2, b2 = _make_params(kp1, C, C_se)
    out = jax.block_until_ready(squeeze_excitation(x, w1, b1, w2, b2, swish=True))
    ref = _reference(x, w1, b1, w2, b2, swish=True)
    assert out.shape == (N, C, H, W)
    assert jnp.allclose(out, ref, atol=1e-5, rtol=1e-5), "mismatch vs reference (case 1)"

    # Case 2: non-128-multiple spatial size (7x7=49, padded to 128) + ReLU path.
    N, C, H, W = 4, 8, 7, 7
    C_se = 4
    x = jax.random.normal(kx2, (N, C, H, W), dtype=jnp.float32)
    w1, b1, w2, b2 = _make_params(kp2, C, C_se)
    out = jax.block_until_ready(squeeze_excitation(x, w1, b1, w2, b2, swish=False))
    ref = _reference(x, w1, b1, w2, b2, swish=False)
    assert out.shape == (N, C, H, W)
    assert jnp.allclose(out, ref, atol=1e-5, rtol=1e-5), "mismatch vs reference (case 2)"

    print("KERNEL_OK")
</pallas_src>

<mosaic_0001>
module attributes {stable_mosaic.version = 11 : i64} {
  func.func @_se_kernel(%arg0: i32, %arg1: memref<1x8x256xf32, #tpu.memory_space<vmem>>, %arg2: memref<8x4xf32, #tpu.memory_space<vmem>>, %arg3: memref<1x4xf32, #tpu.memory_space<vmem>>, %arg4: memref<4x8xf32, #tpu.memory_space<vmem>>, %arg5: memref<1x8xf32, #tpu.memory_space<vmem>>, %arg6: memref<1x8x256xf32, #tpu.memory_space<vmem>>) attributes {dimension_semantics = [#tpu.dimension_semantics<parallel>], iteration_bounds = array<i64: 2>, scalar_prefetch = 0 : i64, scratch_operands = 0 : i64, tpu.core_type = #tpu.core_type<tc>, window_params = [{transform_indices = @transform_0, window_bounds = array<i64: 1, 8, 256>}, {pipeline_mode = #tpu.pipeline_mode<synchronous>, transform_indices = @transform_1, window_bounds = array<i64: 8, 4>}, {pipeline_mode = #tpu.pipeline_mode<synchronous>, transform_indices = @transform_2, window_bounds = array<i64: 1, 4>}, {pipeline_mode = #tpu.pipeline_mode<synchronous>, transform_indices = @transform_3, window_bounds = array<i64: 4, 8>}, {pipeline_mode = #tpu.pipeline_mode<synchronous>, transform_indices = @transform_4, window_bounds = array<i64: 1, 8>}, {transform_indices = @transform_5, window_bounds = array<i64: 1, 8, 256>}]} {
    %c0 = arith.constant 0 : index
    %c0_0 = arith.constant 0 : index
    %c0_1 = arith.constant 0 : index
    %0 = vector.load %arg1[%c0, %c0_0, %c0_1] : memref<1x8x256xf32, #tpu.memory_space<vmem>>, vector<1x8x256xf32>
    %cst = arith.constant dense<0.000000e+00> : vector<1x8xf32>
    %1 = vector.multi_reduction <add>, %0, %cst [2] : vector<1x8x256xf32> to vector<1x8xf32>
    %cst_2 = arith.constant 3.906250e-03 : f32
    %2 = vector.broadcast %cst_2 : f32 to vector<1x8xf32>
    %3 = arith.mulf %1, %2 : vector<1x8xf32>
    %c0_3 = arith.constant 0 : index
    %c0_4 = arith.constant 0 : index
    %4 = vector.load %arg2[%c0_3, %c0_4] : memref<8x4xf32, #tpu.memory_space<vmem>>, vector<8x4xf32>
    %cst_5 = arith.constant dense<0.000000e+00> : vector<1x4xf32>
    %5 = tpu.matmul %3, %4, %cst_5 {dimension_numbers = #tpu.dot_dimension_numbers<[1], [0], [0], [1], [0, 0, 1, 1], [], []>} : vector<1x8xf32>, vector<8x4xf32>, vector<1x4xf32> -> vector<1x4xf32>
    %c0_6 = arith.constant 0 : index
    %c0_7 = arith.constant 0 : index
    %6 = vector.load %arg3[%c0_6, %c0_7] : memref<1x4xf32, #tpu.memory_space<vmem>>, vector<1x4xf32>
    %7 = arith.addf %5, %6 : vector<1x4xf32>
    %8 = arith.negf %7 : vector<1x4xf32>
    %9 = math.exp %8 : vector<1x4xf32>
    %cst_8 = arith.constant 1.000000e+00 : f32
    %10 = vector.broadcast %cst_8 : f32 to vector<1x4xf32>
    %11 = arith.addf %10, %9 : vector<1x4xf32>
    %12 = arith.divf %10, %11 : vector<1x4xf32>
    %13 = arith.mulf %7, %12 : vector<1x4xf32>
    %c0_9 = arith.constant 0 : index
    %c0_10 = arith.constant 0 : index
    %14 = vector.load %arg4[%c0_9, %c0_10] : memref<4x8xf32, #tpu.memory_space<vmem>>, vector<4x8xf32>
    %cst_11 = arith.constant dense<0.000000e+00> : vector<1x8xf32>
    %15 = tpu.matmul %13, %14, %cst_11 {dimension_numbers = #tpu.dot_dimension_numbers<[1], [0], [0], [1], [0, 0, 1, 1], [], []>} : vector<1x4xf32>, vector<4x8xf32>, vector<1x8xf32> -> vector<1x8xf32>
    %c0_12 = arith.constant 0 : index
    %c0_13 = arith.constant 0 : index
    %16 = vector.load %arg5[%c0_12, %c0_13] : memref<1x8xf32, #tpu.memory_space<vmem>>, vector<1x8xf32>
    %17 = arith.addf %15, %16 : vector<1x8xf32>
    %18 = arith.negf %17 : vector<1x8xf32>
    %19 = math.exp %18 : vector<1x8xf32>
    %cst_14 = arith.constant 1.000000e+00 : f32
    %20 = vector.broadcast %cst_14 : f32 to vector<1x8xf32>
    %21 = arith.addf %20, %19 : vector<1x8xf32>
    %22 = arith.divf %20, %21 : vector<1x8xf32>
    %c0_15 = arith.constant 0 : index
    %c0_16 = arith.constant 0 : index
    %c0_17 = arith.constant 0 : index
    %23 = vector.load %arg1[%c0_15, %c0_16, %c0_17] : memref<1x8x256xf32, #tpu.memory_space<vmem>>, vector<1x8x256xf32>
    %24 = vector.shape_cast %22 : vector<1x8xf32> to vector<1x8x1xf32>
    %25 = vector.broadcast %24 : vector<1x8x1xf32> to vector<1x8x256xf32>
    %26 = arith.mulf %23, %25 : vector<1x8x256xf32>
    %c0_18 = arith.constant 0 : index
    %c0_19 = arith.constant 0 : index
    %c0_20 = arith.constant 0 : index
    %27 = vector.load %arg6[%c0_18, %c0_19, %c0_20] : memref<1x8x256xf32, #tpu.memory_space<vmem>>, vector<1x8x256xf32>
    tpu.vector_store %arg6[%c0_18, %c0_19, %c0_20], %26 {strides = array<i32>} : memref<1x8x256xf32, #tpu.memory_space<vmem>>, vector<1x8x256xf32>,
    return
  }
  func.func @transform_0(%arg0: i32) -> (i32, i32, i32) {
    %c0_i32 = arith.constant 0 : i32
    %c0_i32_0 = arith.constant 0 : i32
    %c0_i32_1 = arith.constant 0 : i32
    return %arg0, %c0_i32, %c0_i32_0 : i32, i32, i32
  }
  func.func @transform_1(%arg0: i32) -> (i32, i32) {
    %c0_i32 = arith.constant 0 : i32
    %c0_i32_0 = arith.constant 0 : i32
    %c0_i32_1 = arith.constant 0 : i32
    return %c0_i32, %c0_i32_0 : i32, i32
  }
  func.func @transform_2(%arg0: i32) -> (i32, i32) {
    %c0_i32 = arith.constant 0 : i32
    %c0_i32_0 = arith.constant 0 : i32
    %c0_i32_1 = arith.constant 0 : i32
    return %c0_i32, %c0_i32_0 : i32, i32
  }
  func.func @transform_3(%arg0: i32) -> (i32, i32) {
    %c0_i32 = arith.constant 0 : i32
    %c0_i32_0 = arith.constant 0 : i32
    %c0_i32_1 = arith.constant 0 : i32
    return %c0_i32, %c0_i32_0 : i32, i32
  }
  func.func @transform_4(%arg0: i32) -> (i32, i32) {
    %c0_i32 = arith.constant 0 : i32
    %c0_i32_0 = arith.constant 0 : i32
    %c0_i32_1 = arith.constant 0 : i32
    return %c0_i32, %c0_i32_0 : i32, i32
  }
  func.func @transform_5(%arg0: i32) -> (i32, i32, i32) {
    %c0_i32 = arith.constant 0 : i32
    %c0_i32_0 = arith.constant 0 : i32
    %c0_i32_1 = arith.constant 0 : i32
    return %arg0, %c0_i32, %c0_i32_0 : i32, i32, i32
  }
}

</mosaic_0001>

<bundles_post_ra>
// kernel: tpu_custom_call.1
= control target key start
LH: loop header
LB: loop body
LE: loop exit
PB: predicated region body
PF: predicated region fallthrough
CT: control target
= control target key end

     0   :  { %10 = vsyncpa [#allocation3], 0  ;;  %s800_s0 = inlined_call_operand.hbm [shape: f32[2,8,256], index: 0, kind: input, shape index: {}]   ;;  %s801_s1 = inlined_call_operand.vmem [shape: f32[8,4], index: 1, kind: input, shape index: {}]   ;;  %s802_s2 = inlined_call_operand.vmem [shape: f32[1,4], index: 2, kind: input, shape index: {}]   ;;  %s803_s3 = inlined_call_operand.vmem [shape: f32[4,8], index: 3, kind: input, shape index: {}]   ;;  %s804_s4 = inlined_call_operand.vmem [shape: f32[1,8], index: 4, kind: input, shape index: {}]   ;;  %s805_s5 = inlined_call_operand.hbm [shape: f32[2,8,256], index: 5, kind: output, shape index: {}]  }
   0x1   :  { %12 = vsyncpa [#allocation3 + $0x1], 0 }
   0x2   :  { %13 = vsyncpa [#allocation4], 0 }
   0x3   :  { %15 = vsyncpa [#allocation4 + $0x1], 0  ;;  %s649_s18 = smov 0   ;;  %s651_s19 = smov 0  }
   0x4   :  { %s653_s20 = smov 0   ;;  %s655_s21 = smov 0  }
   0x5 LB: > { %s670_s22 = sadd.s32 4294967295, %s617_s21   ;;  %s445_s23 = sadd.s32 4294967294, %s617_s21   ;;  %s617_s21 = sphi %s655_s21, %s815_s21   ;;  %s613_s20 = sphi %s653_s20, %s814_s20   ;;  %s609_s19 = sphi %s651_s19, %s813_s19   ;;  %s605_s18 = sphi %s649_s18, %s812_s18  }
   0x6   : > { %s674_s24 = sadd.s32 1, %s617_s21   ;;  %s28_s25 = sadd.s32 1, %s613_s20 }
   0x7   : > { %s25_s26 = ssub.s32 %s617_s21, %s674_s24  ;;  %p35_p0 = scmp.ne.s32.totalorder %s613_s20, %s609_s19 }
   0x8   : > { %p26_p1 = scmp.eq.s32.totalorder %s25_s26, 0  ;;  %p36_p2 = scmp.eq.s32.totalorder %s617_s21, 0 }
   0x9   : > { %p41_p3 = scmp.ne.s32.totalorder %s609_s19, %s605_s18  ;;  %p42_p4 = scmp.eq.s32.totalorder %s670_s22, 0 }
   0xa   : > { %s686_s27 = scalar_select %p26_p1, %s613_s20, %s28_s25  }
   0xb   : > { %p688_p5 = por %p36_p2, %p35_p0  ;;  %p692_p6 = por %p42_p4, %p41_p3 }
   0xc   : > { %p149_p7 = scmp.eq.s32.totalorder %s670_s22, 1  ;;  %p155_p8 = scmp.eq.s32.totalorder %s445_s23, 1 }
   0xd   : > { %p478_p10 = scmp.lt.s32.totalorder %s617_s21, 2  ;;  %s187_s7 = sand.u32 1, %s613_s20  }
   0xe   : > { %p699_p11 = por %p149_p7, %p35_p0  ;;  %p703_p12 = por %p155_p8, %p41_p3 }
   0xf   : > { %s464_s8 = sshll.u32 %s617_s21, 4  ;;  %s448_s9 = sshll.u32 %s187_s7, 4 }
  0x10   : > { %s196_s12 = scalar_lea.hbm %s800_s0, %s464_s8  ;;  %s191_s14 = scalar_lea.vmem [#allocation2], %s448_s9 }
  0x11   : > { %s198_s13 = sshll.u32 %s196_s12, 4  ;;  %s200_s15 = sshll.u32 %s191_s14, 4  ;;  %s199_s13 = int_to_ptr.hbm [resolvable:$true] %s198_s13  ;;  %s201_s15 = int_to_ptr.vmem [resolvable:$true] %s200_s15 }
  0x12   : > { %p714_p13 = pnand %p478_p10, %p688_p5  ;;  %p451_p0 = scmp.ge.s32.totalorder %s617_s21, 1 }
  0x13   : > { %p205_p1 = scmp.lt.s32.totalorder %s617_s21, 3  ;;  %s188_s17 = scalar_lea.sflag [#allocation3], %s187_s7 }
  0x14   : > { %s521_s23 = sshra.s32 %s199_s13, 4  ;;  %p525_p3 = pneg %p714_p13  ;;  %s522_s23 = int_to_ptr.hbm [resolvable:$true] %s521_s23 }
  0x15   : > { %s523_s25 = scalar_lea.hbm %s522_s23, 16  ;;  %s528_s28 = scalar_lea.hbm %s800_s0, 32 }
  0x16   : > { %p524_p2 = scmp.ne.s32.totalorder %s522_s23, %s523_s25  ;;  %p529_p5 = scmp.lt.s32.totalorder %s522_s23, %s800_s0 }
  0x17   : > { %p530_p8 = scmp.lt.s32.totalorder %s528_s28, %s523_s25 }
  0x18   : > { %p526_p4 = pnand %p525_p3, %p524_p2 }
  0x19   : > { %p531_p10 = por %p530_p8, %p529_p5 }
  0x1a   : > { %p527_p7 = pneg %p526_p4 }
  0x1c   : > { %p532_p9 = pnand %p531_p10, %p527_p7 }
  0x1e   : > { %535 = shalt.err (!%p532_p9)
}
  0x1f   : > { %473 = dma.hbm_to_vmem [thread:$0]  (!%p714_p13), %s199_s13, 256, %s201_s15, %s188_s17  }
  0x20   : > { %p206_p2 = pnand %p451_p0, %p205_p1 }
  0x21   : > { %s735_s7 = sand.u32 (!%p206_p2), 1, %s609_s19  }
  0x22   : > { %209 = sbr.rel (%p206_p2) target bundleno = 600 (0x258), region = 40  ;;  %s452_s11 = sshll.u32 (!%p206_p2), %s735_s7, 4 }
  0x23   : > { %s212_s12 = scalar_lea.sflag (!%p206_p2), [#allocation3], %s735_s7  ;;  %s215_s14 = scalar_lea.vmem (!%p206_p2), [#allocation2], %s452_s11 }
  0x27   : > { %596 = dma.done.wait (%p692_p6), %s212_s12, 256  }
  0x28   : > { %598 = vsyncadd (%p692_p6), %s212_s12, 4294967040  ;;  %v745_v0 = vld [vmem:[%s215_s14] sm:$0xff]  ;;  %v747_v1 = vld [vmem:[%s215_s14 + $0x8] sm:$0xff]  ;;  %v252_v4 = vlaneseq  ;;  %vm255_vm0 = vcmask 64512   ;;  %vm304_vm1 = vcmask 1043456   ;;  %vm300_vm6 = vcmask 31744  }
  0x29   : > { %v245_v2 = vadd.f32 %v747_v1, %v745_v0  ;;  %v249_v3 = vld [vmem:[%s801_s1] sm:$0xff]  ;;  %s465_s8 = sshll.u32 %s670_s22, 4  ;;  %s242_s12 = scalar_lea.vmem [#allocation5], %s452_s11 }
  0x2a   : > { %273 = vmatpush.msra.mxu0 %v249_v3  ;;  %v253_v5 = vand.u32 127, %v252_v4  ;;  %v250_v9 = vld [vmem:[%s802_s2] sm:$0x1]  ;;  %v349_v27 = vshrl.u32 %v252_v4, 7  ;;  %s370_s10 = scalar_lea.hbm %s805_s5, %s465_s8  ;;  %s372_s14 = sshll.u32 %s242_s12, 4  ;;  %s373_s14 = int_to_ptr.vmem [resolvable:$true] %s372_s14 }
  0x2b   : > { %246 = vadd.xlane.f32.xlu0 %v245_v2  ;;  %v298_v10 = vld [vmem:[%s803_s3] sm:$0xf]  ;;  %s374_s13 = sshll.u32 %s370_s10, 4  ;;  %s359_s15 = scalar_lea.sflag [#allocation4], %s735_s7  ;;  %s375_s13 = int_to_ptr.hbm [resolvable:$true] %s374_s13 }
  0x2c   : > { %456 = vmatpush.msk.msra.mxu1 %vm304_vm1, %v298_v10  ;;  %512 = vset.pattern.permute.xlu0 %v349_v27  ;;  %v299_v28 = vld [vmem:[%s804_s4] sm:$0x1]  ;;  %s565_s22 = sshra.s32 %s375_s13, 4  ;;  %s571_s17 = scalar_lea.hbm %s805_s5, 32  ;;  %s566_s22 = int_to_ptr.hbm [resolvable:$true] %s565_s22 }
  0x2d   : > { %s567_s29 = scalar_lea.hbm %s566_s22, 16  ;;  %p572_p0 = scmp.lt.s32.totalorder %s566_s22, %s805_s5 }
  0x2e   : > { %p568_p6 = scmp.ne.s32.totalorder %s566_s22, %s567_s29  ;;  %p573_p1 = scmp.lt.s32.totalorder %s571_s17, %s567_s29 }
  0x30   : > { %p569_p9 = pnand %p568_p6, %p699_p11  ;;  %p574_p3 = por %p573_p1, %p572_p0 }
  0x32   : > { %p570_p13 = pneg %p569_p9 }
  0x34   : > { %p575_p4 = pnand %p574_p3, %p570_p13 }
  0x9e   : > { %v247_v6 = vpop.xlane.xlu0 %246 }
  0x9f   : > { %v248_v7 = vmul.f32 0.00390625, %v247_v6 }
  0xa1   : > { %v254_v8 = vperm.slane %v248_v7, %v253_v5 }
  0xa3   : > { %454 = vmatmul.msk.f32.vlgmr.msra.gmra.mxu0 %vm255_vm0, %v254_v8 }
 0x120   : > { %v275_v11 = vpop.f32.mrf.mxu0 }
 0x121   : > { %v276_v12 = vadd.f32 %v275_v11, %v250_v9 }
 0x123   : > { %v455_v13 = vmul.f32 -1.442695, %v276_v12 }
 0x125   : > { %513 = vpow2.f32 %v455_v13 }
 0x12b   : > { %v514_v14 = vpop.eup %513 }
 0x12c   : > { %v281_v15 = vadd.f32 1.0, %v514_v14 }
 0x12e   : > { %515 = vrcp.f32 %v281_v15  ;;  %v293_v19 = vand.u32 2147483648, %v281_v15  ;;  %v291_v21 = vand.u32 2147483647, %v281_v15  ;;  %vm287_vm3 = vweird.f32 %v281_v15 }
 0x130   : > { %v294_v23 = vor.u32 1.1754944e-38, %v293_v19  ;;  %vm292_vm5 = vcmp.eq.f32.partialorder %v291_v21, 8.507059e+37 }
 0x134   : > { %v516_v16 = vpop.eup %515 }
 0x135   : > { %v283_v17 = vmul.f32 %v516_v16, %v281_v15  ;;  %vm288_vm2 = vweird.f32 %v516_v16 }
 0x136   : > { %vm289_vm4 = vmor %vm287_vm3, %vm288_vm2 }
 0x137   : > { %v284_v18 = vsub.f32 1.0, %v283_v17 }
 0x139   : > { %v285_v20 = vmul.f32 %v516_v16, %v284_v18 }
 0x13b   : > { %v286_v22 = vadd.f32 %v516_v16, %v285_v20 }
 0x13d   : > { %v290_v24 = vsel %vm289_vm4, %v516_v16, %v286_v22 }
 0x13e   : > { %v295_v25 = vsel %vm292_vm5, %v294_v23, %v290_v24 }
 0x13f   : > { %v297_v26 = vmul.f32 %v295_v25, %v276_v12 }
 0x141   : > { %457 = vmatmul.msk.f32.vlgmr.msra.gmra.mxu1 %vm300_vm6, %v297_v26 }
 0x1be   : > { %v325_v29 = vpop.f32.mrf.mxu1 }
 0x1bf   : > { %v326_v30 = vadd.f32 %v325_v29, %v299_v28 }
 0x1c1   : > { %v458_v31 = vmul.f32 -1.442695, %v326_v30 }
 0x1c3   : > { %517 = vpow2.f32 %v458_v31 }
 0x1c9   : > { %v518_v32 = vpop.eup %517 }
 0x1ca   : > { %v331_v33 = vadd.f32 1.0, %v518_v32 }
 0x1cc   : > { %519 = vrcp.f32 %v331_v33  ;;  %v343_v37 = vand.u32 2147483648, %v331_v33  ;;  %v341_v39 = vand.u32 2147483647, %v331_v33  ;;  %vm337_vm8 = vweird.f32 %v331_v33 }
 0x1ce   : > { %v344_v41 = vor.u32 1.1754944e-38, %v343_v37  ;;  %vm342_vm10 = vcmp.eq.f32.partialorder %v341_v39, 8.507059e+37 }
 0x1d2   : > { %v520_v34 = vpop.eup %519 }
 0x1d3   : > { %v333_v35 = vmul.f32 %v520_v34, %v331_v33  ;;  %vm338_vm7 = vweird.f32 %v520_v34 }
 0x1d4   : > { %vm339_vm9 = vmor %vm337_vm8, %vm338_vm7 }
 0x1d5   : > { %v334_v36 = vsub.f32 1.0, %v333_v35 }
 0x1d7   : > { %v335_v38 = vmul.f32 %v520_v34, %v334_v36 }
 0x1d9   : > { %v336_v40 = vadd.f32 %v520_v34, %v335_v38 }
 0x1db   : > { %v340_v42 = vsel %vm339_vm9, %v520_v34, %v336_v40 }
 0x1dc   : > { %v345_v43 = vsel %vm342_vm10, %v344_v41, %v340_v42 }
 0x1dd   : > { %v347_v44 = vperm.slane %v345_v43, 0 }
 0x1df   : > { %352 = vperm.xlu0 %512, %v347_v44  }
 0x251   : > { %v353_v45 = vpop.permute.xlu0 %352 }
 0x252   : > { %v354_v46 = vmul.f32 %v353_v45, %v745_v0  ;;  %v355_v47 = vmul.f32 %v353_v45, %v747_v1 }
 0x254   : > { %356 = vst [vmem:[%s242_s12] sm:$0xff] %v354_v46 }
 0x255   : > { %357 = vst [vmem:[%s242_s12 + $0x8] sm:$0xff] %v355_v47 }
 0x256   : > { %578 = shalt.err (!%p575_p4)
}
 0x257   : > { %468 = dma.vmem_to_hbm [thread:$0]  (%p699_p11), %s373_s14, 256, %s375_s13, %s359_s15  }
 0x258 PF: > { %s386_s7 = sand.u32 1, %s605_s18   ;;  %p811_p7 = scmp.ge.s32.totalorder %s617_s21, 2 }
 0x259   : > { %s387_s26 = scalar_lea.sflag [#allocation4], %s386_s7 }
 0x25a   : > { %p475_p5 = pnand %p811_p7, %p703_p12 }
 0x25c   : > { %p476_p8 = pneg %p475_p5 }
 0x25e   : > { %600 = dma.done.wait (%p476_p8), %s387_s26, 256  }
 0x25f   : > { %602 = vsyncadd (%p476_p8), %s387_s26, 4294967040  ;;  %p18_p10 = scmp.ge.s32.totalorder %s674_s24, 4   ;;  %s812_s18 = smov %s609_s19 }
 0x260   : > { %s813_s19 = smov %s613_s20  ;;  %s814_s20 = smov %s686_s27 }
 0x261   : > { %s815_s21 = smov %s674_s24  ;;  %20 = sbr.rel (!%p18_p10) target bundleno = 5 (0x5), region = 85 }
 0x266   :  { %393 = vsyncpa [#allocation3], 1 }
 0x267   :  { %395 = vsyncpa [#allocation3 + $0x1], 1 }
 0x268   :  { %396 = vsyncpa [#allocation4], 1 }
 0x269   :  { %398 = vsyncpa [#allocation4 + $0x1], 1 }

</bundles_post_ra>
